<compile_context>
chip_gen: v7x
topology: tpu7x:2x2x1
jax: 0.10.0
libtpu: 0.0.40
codegen_flags: <defaults>
</compile_context>

<pallas_src>
import jax
import jax.numpy as jnp
import numpy as np
from jax.experimental import pallas as pl
from jax.experimental.pallas import tpu as pltpu

# Synthetic irreps: "8x0e + 8x1o + 4x2e"  (parity does not affect the dot).
IRREPS_IN = [(8, 0), (8, 1), (4, 2)]


def _round_up(x: int, m: int) -> int:
    return ((x + m - 1) // m) * m


def irreps_dims(irreps):
    in_dim = sum(mul * (2 * l + 1) for mul, l in irreps)
    out_dim = sum(mul for mul, _ in irreps)
    return in_dim, out_dim


def build_segment_matrix(irreps, dtype=jnp.float32):
    """0/1 selection matrix S (in_dim, out_dim): S[j, k] = 1 iff input slot j
    (irrep block i, channel u, component m) reduces into output scalar k."""
    in_dim, out_dim = irreps_dims(irreps)
    S = np.zeros((in_dim, out_dim), dtype=np.float32)
    j, k = 0, 0
    for mul, l in irreps:
        d = 2 * l + 1
        for _ in range(mul):
            S[j:j + d, k] = 1.0
            j += d
            k += 1
    return jnp.asarray(S, dtype=dtype)


def equivariant_dot_kernel(f1_ref, f2_ref, s_ref, o_ref):
    # VPU elementwise product + segmented reduction as MXU matmul against the
    # 0/1 segment matrix. Exact in f32 (S is 0/1, f32 accumulator forced).
    p = f1_ref[...] * f2_ref[...]
    o_ref[...] = jnp.dot(
        p, s_ref[...], preferred_element_type=jnp.float32
    ).astype(o_ref.dtype)


def equivariant_dot(f1, f2, irreps=IRREPS_IN, tile_n=1024):
    N, D = f1.shape
    in_dim, out_dim = irreps_dims(irreps)
    assert D == in_dim and f2.shape == f1.shape, \
        "Input tensor must have the same last dimension as the irreps"
    S = build_segment_matrix(irreps, dtype=f1.dtype)

    # Row tile: large (HBM-bound -> amortize per-step overhead), multiple of 8
    # (sublane), capped for small inputs.
    tile = max(8, min(_round_up(tile_n, 8), _round_up(N, 8)))
    n_pad = _round_up(N, tile)
    if n_pad != N:
        pad = ((0, n_pad - N), (0, 0))
        f1 = jnp.pad(f1, pad)
        f2 = jnp.pad(f2, pad)
    grid = n_pad // tile

    out = pl.pallas_call(
        equivariant_dot_kernel,
        out_shape=jax.ShapeDtypeStruct((n_pad, out_dim), f1.dtype),
        grid_spec=pltpu.PrefetchScalarGridSpec(
            num_scalar_prefetch=0,
            grid=(grid,),
            in_specs=[
                pl.BlockSpec((tile, in_dim), lambda i: (i, 0)),
                pl.BlockSpec((tile, in_dim), lambda i: (i, 0)),
                # S: tiny (~4 KiB) constant matrix; constant block index means
                # it stays resident in VMEM across all grid steps.
                pl.BlockSpec((in_dim, out_dim), lambda i: (0, 0)),
            ],
            out_specs=pl.BlockSpec((tile, out_dim), lambda i: (i, 0)),
        ),
        compiler_params=pltpu.CompilerParams(
            dimension_semantics=("parallel",)),
    )(f1, f2, S)

    return out[:N] if n_pad != N else out


def equivariant_dot_ref(f1, f2, irreps=IRREPS_IN):
    # Pure-JAX reference mirroring e3nn's TensorProduct semantics.
    outs, j = [], 0
    for mul, l in irreps:
        d = 2 * l + 1
        x1 = f1[:, j:j + mul * d].reshape(-1, mul, d)
        x2 = f2[:, j:j + mul * d].reshape(-1, mul, d)
        outs.append(jnp.sum(x1 * x2, axis=-1))
        j += mul * d
    return jnp.concatenate(outs, axis=-1)


if __name__ == "__main__":
    key = jax.random.PRNGKey(0)
    in_dim, out_dim = irreps_dims(IRREPS_IN)   # 52, 20

    # Small case (single grid step, tile auto-capped).
    k1, k2, k3, k4 = jax.random.split(key, 4)
    N1 = 16
    f1 = jax.random.normal(k1, (N1, in_dim), dtype=jnp.float32)
    f2 = jax.random.normal(k2, (N1, in_dim), dtype=jnp.float32)
    out = jax.block_until_ready(equivariant_dot(f1, f2))
    ref = equivariant_dot_ref(f1, f2)
    assert out.shape == (N1, out_dim)
    np.testing.assert_allclose(np.asarray(out), np.asarray(ref),
                               rtol=1e-5, atol=1e-5)

    # Ragged case exercising zero-padding + multi-step parallel grid.
    N2 = 300
    g1 = jax.random.normal(k3, (N2, in_dim), dtype=jnp.float32)
    g2 = jax.random.normal(k4, (N2, in_dim), dtype=jnp.float32)
    out2 = jax.block_until_ready(equivariant_dot(g1, g2, tile_n=128))
    ref2 = equivariant_dot_ref(g1, g2)
    assert out2.shape == (N2, out_dim)
    np.testing.assert_allclose(np.asarray(out2), np.asarray(ref2),
                               rtol=1e-5, atol=1e-5)

    print("KERNEL_OK")
</pallas_src>

<mosaic_0001>
module attributes {stable_mosaic.version = 11 : i64} {
  func.func @equivariant_dot_kernel(%arg0: i32, %arg1: memref<16x52xf32, #tpu.memory_space<vmem>>, %arg2: memref<16x52xf32, #tpu.memory_space<vmem>>, %arg3: memref<52x20xf32, #tpu.memory_space<vmem>>, %arg4: memref<16x20xf32, #tpu.memory_space<vmem>>) attributes {dimension_semantics = [#tpu.dimension_semantics<parallel>], iteration_bounds = array<i64: 1>, scalar_prefetch = 0 : i64, scratch_operands = 0 : i64, tpu.core_type = #tpu.core_type<tc>, window_params = [{transform_indices = @transform_0, window_bounds = array<i64: 16, 52>}, {transform_indices = @transform_1, window_bounds = array<i64: 16, 52>}, {pipeline_mode = #tpu.pipeline_mode<synchronous>, transform_indices = @transform_2, window_bounds = array<i64: 52, 20>}, {transform_indices = @transform_3, window_bounds = array<i64: 16, 20>}]} {
    %c0 = arith.constant 0 : index
    %c0_0 = arith.constant 0 : index
    %0 = vector.load %arg1[%c0, %c0_0] : memref<16x52xf32, #tpu.memory_space<vmem>>, vector<16x52xf32>
    %c0_1 = arith.constant 0 : index
    %c0_2 = arith.constant 0 : index
    %1 = vector.load %arg2[%c0_1, %c0_2] : memref<16x52xf32, #tpu.memory_space<vmem>>, vector<16x52xf32>
    %2 = arith.mulf %0, %1 : vector<16x52xf32>
    %c0_3 = arith.constant 0 : index
    %c0_4 = arith.constant 0 : index
    %3 = vector.load %arg3[%c0_3, %c0_4] : memref<52x20xf32, #tpu.memory_space<vmem>>, vector<52x20xf32>
    %cst = arith.constant dense<0.000000e+00> : vector<16x20xf32>
    %4 = tpu.matmul %2, %3, %cst {dimension_numbers = #tpu.dot_dimension_numbers<[1], [0], [0], [1], [0, 0, 1, 1], [], []>} : vector<16x52xf32>, vector<52x20xf32>, vector<16x20xf32> -> vector<16x20xf32>
    %c0_5 = arith.constant 0 : index
    %c0_6 = arith.constant 0 : index
    %5 = vector.load %arg4[%c0_5, %c0_6] : memref<16x20xf32, #tpu.memory_space<vmem>>, vector<16x20xf32>
    tpu.vector_store %arg4[%c0_5, %c0_6], %4 {strides = array<i32>} : memref<16x20xf32, #tpu.memory_space<vmem>>, vector<16x20xf32>,
    return
  }
  func.func @transform_0(%arg0: i32) -> (i32, i32) {
    %c0_i32 = arith.constant 0 : i32
    %c0_i32_0 = arith.constant 0 : i32
    return %arg0, %c0_i32 : i32, i32
  }
  func.func @transform_1(%arg0: i32) -> (i32, i32) {
    %c0_i32 = arith.constant 0 : i32
    %c0_i32_0 = arith.constant 0 : i32
    return %arg0, %c0_i32 : i32, i32
  }
  func.func @transform_2(%arg0: i32) -> (i32, i32) {
    %c0_i32 = arith.constant 0 : i32
    %c0_i32_0 = arith.constant 0 : i32
    %c0_i32_1 = arith.constant 0 : i32
    return %c0_i32, %c0_i32_0 : i32, i32
  }
  func.func @transform_3(%arg0: i32) -> (i32, i32) {
    %c0_i32 = arith.constant 0 : i32
    %c0_i32_0 = arith.constant 0 : i32
    return %arg0, %c0_i32 : i32, i32
  }
}

</mosaic_0001>

<bundles_post_ra>
// kernel: tpu_custom_call.1
= control target key start
LH: loop header
LB: loop body
LE: loop exit
PB: predicated region body
PF: predicated region fallthrough
CT: control target
= control target key end

     0   :  { %vm28_vm0 = vcmask 424960   ;;  %s271_s0 = inlined_call_operand.vmem [shape: f32[16,52], index: 0, kind: input, shape index: {}]   ;;  %s272_s1 = inlined_call_operand.vmem [shape: f32[16,52], index: 1, kind: input, shape index: {}]   ;;  %s273_s2 = inlined_call_operand.vmem [shape: f32[52,20], index: 2, kind: input, shape index: {}]   ;;  %s274_s3 = inlined_call_operand.hbm [shape: f32[16,20], index: 3, kind: output, shape index: {}]  }
   0x1   :  { %v21_v0 = vld [vmem:[%s273_s2] sm:$0xff]  ;;  %v22_v1 = vld [vmem:[%s273_s2 + $0x8] sm:$0xff]  ;;  %v23_v2 = vld [vmem:[%s273_s2 + $0x10] sm:$0xff] }
   0x2   :  { %v162_v3 = vpack.c.bf16 %v22_v1, %v21_v0  ;;  %v24_v4 = vld [vmem:[%s273_s2 + $0x18] sm:$0xff]  ;;  %v25_v5 = vld [vmem:[%s273_s2 + $0x20] sm:$0xff]  ;;  %v26_v7 = vld [vmem:[%s273_s2 + $0x28] sm:$0xff] }
   0x3   :  { %v166_v6 = vpack.c.bf16 %v24_v4, %v23_v2  ;;  %v15_v8 = vld [vmem:[%s271_s0] sm:$0xff] }
   0x4   :  { %v17_v9 = vld [vmem:[%s272_s1] sm:$0xff]  ;;  %163 = vmatprep.subr.bf16.mxu0 %v162_v3 }
   0x5   :  { %v19_v10 = vmul.f32 %v17_v9, %v15_v8 }
   0x6   :  { %8 = vsyncpa [#allocation3], 0  ;;  %165 = vmatpush3.bf16.msra.mxu0 %v162_v3  ;;  %v170_v11 = vpack.c.bf16 %v26_v7, %v25_v5  ;;  %v27_v12 = vld [vmem:[%s273_s2 + $0x30] sm:$0xf]  ;;  %vm35_vm1 = vcmask 1043456   ;;  %v16_v13 = vld [vmem:[%s271_s0 + $0x8] sm:$0xff] }
   0x7   :  { %167 = vmatprep.subr.bf16.mxu0 %v166_v6  ;;  %159 = vmatprep.mubr.msk.f32.mxu0 %vm28_vm0, %v19_v10  ;;  %v18_v14 = vld [vmem:[%s272_s1 + $0x8] sm:$0xff]  ;;  %s201_s7 = smov [#allocation2]   ;;  %vm114_vm2 = vcmask 162816  }
   0x8   :  { %v20_v15 = vmul.f32 %v18_v14, %v16_v13  ;;  %s122_s8 = sshll.u32 %s201_s7, 4  ;;  %s123_s8 = int_to_ptr.vmem [resolvable:$true] %s122_s8 }
   0x9   :  { %s177_s2 = scalar_lea.vmem %s123_s8, 256  ;;  %p182_p1 = scmp.lt.s32.totalorder %s123_s8, %s123_s8 }
   0xa   :  { %169 = vmatpush3.bf16.msra.mxu0 %v166_v6  ;;  %p178_p0 = scmp.ne.s32.totalorder %s123_s8, %s177_s2  ;;  %p183_p2 = scmp.lt.s32.totalorder %s177_s2, %s177_s2 }
   0xb   :  { %171 = vmatprep.subr.bf16.mxu0 %v170_v11 }
   0xc   :  { %p184_p3 = por %p183_p2, %p182_p1 }
   0xe   :  { %173 = vmatpush3.bf16.msra.mxu0 %v170_v11  ;;  %p185_p4 = pnand %p184_p3, %p178_p0 }
   0xf   :  { %157 = vmatprep.subr.msk.mxu0 %vm35_vm1, %v27_v12 }
  0x12   :  { %158 = vmatpush3.msk.msra.mxu0 %vm35_vm1, %v27_v12 }
  0x13   :  { %160 = vmatmul.mubr.msk.f32.vlgmr.msra.gmra.mrb[0].mxu0 %vm28_vm0, %v20_v15 }
  0xe6   :  { %v161_v16 = vpop.f32.mrb[0].mxu0 }
  0xe7   :  { %116 = vst.msk [vmem:[#allocation2 + $0x8] sm:$0xff] %vm114_vm2, %v161_v16  ;;  %v105_v17 = vpop.f32.mrb[1].mxu0 }
  0xe8   :  { %115 = vst.msk [vmem:[#allocation2] sm:$0xff] %vm114_vm2, %v105_v17 }
  0xe9   :  { %188 = shalt.err (!%p185_p4)
}
  0xea   :  { %s189_s9 = scalar_lea.hbm %s274_s3, 256 }
  0xeb   :  { %p190_p5 = scmp.ne.s32.totalorder %s274_s3, %s189_s9  ;;  %p193_p6 = scmp.lt.u32.totalorder %s189_s9, %s274_s3 }
  0xed   :  { %p195_p7 = pnand %p193_p6, %p190_p5 }
  0xef   :  { %198 = shalt.err (!%p195_p7)
}
  0xf0   :  { %s202_s14 = smov 128   ;;  %s203_s15 = smov 8  }
  0xf1   :  { %128 = dma.vmem_to_hbm [thread:$0]  %s123_s8, 256, %s274_s3, [#allocation3], %s202_s14, %s202_s14, %s203_s15  }
  0xf2   :  { %199 = dma.done.wait [#allocation3], 256  }
  0xf3   :  { %200 = vsyncadd [#allocation3], 4294967040 }
  0xf4   :  { %132 = vsyncpa [#allocation3], 1 }

</bundles_post_ra>
